<compile_context>
chip_gen: v5e
topology: v5e:2x2
jax: 0.10.0
libtpu: 0.0.40
codegen_flags: <defaults>
</compile_context>

<pallas_src>
import functools
import math

import jax
import jax.numpy as jnp
from jax.experimental import pallas as pl
from jax.experimental.pallas import tpu as pltpu


def layernorm_kernel(x_ref, gamma_ref, bias_ref, mean_ref, o_ref, *, eps):
    """One (row_tile, dim) tile: per-row variance, global-mean shift, affine."""
    h = x_ref[...].astype(jnp.float32)                       # (TR, dim) f32

    # per-row mean of squares (dim=-1, keepdim=True)  -> XLU lane reduction
    variance = jnp.mean(h * h, axis=-1, keepdims=True)       # (TR, 1)

    # global mean over the whole (unpadded) tensor, precomputed outside
    global_mean = mean_ref[0, 0]                              # scalar from SMEM

    h = (h - global_mean) * jax.lax.rsqrt(variance + eps)     # EUP rsqrt

    gamma = gamma_ref[...].astype(jnp.float32)                # (1, dim)
    bias = bias_ref[...].astype(jnp.float32)                  # (1, dim)
    o_ref[...] = (gamma * h - bias).astype(o_ref.dtype)       # MINUS bias (as in spec)


def _choose_row_tile(rows, dim, *, target_bytes=2 << 20, max_rows=1024):
    """Row tile: multiple of 8 sublanes, ~target_bytes of f32 per buffer."""
    rows_p8 = ((rows + 7) // 8) * 8
    tr = max(8, (target_bytes // max(dim * 4, 1)) // 8 * 8)
    tr = min(tr, max_rows, rows_p8)
    return tr


def layernorm(x, gamma, bias, eps, *, row_tile=None):
    orig_shape = x.shape
    dim = orig_shape[-1]
    rows = math.prod(orig_shape[:-1]) if len(orig_shape) > 1 else 1

    x2 = x.reshape(rows, dim)
    g2 = gamma.reshape(1, dim)
    b2 = bias.reshape(1, dim)

    # Global mean over the ORIGINAL (unpadded) tensor, in f32 like torch.mean.
    global_mean = jnp.mean(x2.astype(jnp.float32)).reshape(1, 1)

    tr = row_tile if row_tile is not None else _choose_row_tile(rows, dim)
    num_tiles = pl.cdiv(rows, tr)
    rows_p = num_tiles * tr
    if rows_p != rows:
        # Padded rows only affect their own (discarded) output rows.
        x2 = jnp.pad(x2, ((0, rows_p - rows), (0, 0)))

    out = pl.pallas_call(
        functools.partial(layernorm_kernel, eps=eps),
        out_shape=jax.ShapeDtypeStruct((rows_p, dim), x.dtype),
        grid=(num_tiles,),
        in_specs=[
            pl.BlockSpec((tr, dim), lambda i: (i, 0)),            # x row tile
            pl.BlockSpec((1, dim), lambda i: (0, 0)),              # gamma (resident)
            pl.BlockSpec((1, dim), lambda i: (0, 0)),              # bias  (resident)
            pl.BlockSpec(memory_space=pltpu.MemorySpace.SMEM),     # (1,1) global mean
        ],
        out_specs=pl.BlockSpec((tr, dim), lambda i: (i, 0)),
        compiler_params=pltpu.CompilerParams(
            # Row tiles are independent -> parallel (v7x 2-TC sharding; no-op on 1-TC chips).
            dimension_semantics=("parallel",),
            # ~2 MiB tiles double-buffered (in + out) stay well under this on all gens.
            vmem_limit_bytes=32 * 1024 * 1024,
        ),
    )(x2, g2, b2, global_mean)

    if rows_p != rows:
        out = out[:rows]
    return out.reshape(orig_shape)


def layernorm_ref(x, gamma, bias, eps):
    h = x.astype(jnp.float32)
    variance = jnp.mean(h * h, axis=-1, keepdims=True)
    h = (h - jnp.mean(h)) * jax.lax.rsqrt(variance + eps)
    return (gamma * h - bias).astype(x.dtype)


if __name__ == "__main__":
    key = jax.random.PRNGKey(0)
    eps = 1e-6

    # Test 1: module-sized input (batch=2, seq=8, hidden=32), single tile.
    batch, seq, dim = 2, 8, 32
    x = jax.random.normal(key, (batch, seq, dim), dtype=jnp.float32)
    gamma = jnp.ones((dim,), dtype=jnp.float32)   # nn.Parameter(torch.ones(dim))
    bias = jnp.ones((dim,), dtype=jnp.float32)    # nn.Parameter(torch.ones(dim))

    out = jax.block_until_ready(layernorm(x, gamma, bias, eps))
    ref = layernorm_ref(x, gamma, bias, eps)
    assert out.shape == x.shape and out.dtype == x.dtype
    assert jnp.allclose(out, ref, atol=1e-5, rtol=1e-5)

    # Test 2: exercise the multi-tile grid + row padding path (rows=99, tile=16).
    k2 = jax.random.PRNGKey(1)
    dim2 = 128
    x2 = jax.random.normal(k2, (3, 33, dim2), dtype=jnp.float32)
    g2 = jnp.ones((dim2,), dtype=jnp.float32)
    b2 = jnp.ones((dim2,), dtype=jnp.float32)

    out2 = jax.block_until_ready(layernorm(x2, g2, b2, eps, row_tile=16))
    ref2 = layernorm_ref(x2, g2, b2, eps)
    assert out2.shape == x2.shape and out2.dtype == x2.dtype
    assert jnp.allclose(out2, ref2, atol=1e-5, rtol=1e-5)

    print("KERNEL_OK")
</pallas_src>

<mosaic_0001>
module attributes {stable_mosaic.version = 11 : i64} {
  func.func @layernorm_kernel(%arg0: i32, %arg1: memref<16x32xf32, #tpu.memory_space<vmem>>, %arg2: memref<1x32xf32, #tpu.memory_space<vmem>>, %arg3: memref<1x32xf32, #tpu.memory_space<vmem>>, %arg4: memref<1x1xf32, #tpu.memory_space<smem>>, %arg5: memref<16x32xf32, #tpu.memory_space<vmem>>) attributes {dimension_semantics = [#tpu.dimension_semantics<parallel>], iteration_bounds = array<i64: 1>, scalar_prefetch = 0 : i64, scratch_operands = 0 : i64, tpu.core_type = #tpu.core_type<tc>, window_params = [{transform_indices = @transform_0, window_bounds = array<i64: 16, 32>}, {pipeline_mode = #tpu.pipeline_mode<synchronous>, transform_indices = @transform_1, window_bounds = array<i64: 1, 32>}, {pipeline_mode = #tpu.pipeline_mode<synchronous>, transform_indices = @transform_2, window_bounds = array<i64: 1, 32>}, {transform_indices = @transform_3, window_bounds = array<i64: 1, 1>}, {transform_indices = @transform_4, window_bounds = array<i64: 16, 32>}]} {
    %c0 = arith.constant 0 : index
    %c0_0 = arith.constant 0 : index
    %0 = vector.load %arg1[%c0, %c0_0] : memref<16x32xf32, #tpu.memory_space<vmem>>, vector<16x32xf32>
    %1 = arith.mulf %0, %0 : vector<16x32xf32>
    %cst = arith.constant dense<0.000000e+00> : vector<16xf32>
    %2 = vector.multi_reduction <add>, %1, %cst [1] : vector<16x32xf32> to vector<16xf32>
    %3 = vector.shape_cast %2 : vector<16xf32> to vector<16x1xf32>
    %cst_1 = arith.constant 3.200000e+01 : f32
    %4 = vector.broadcast %cst_1 : f32 to vector<16x1xf32>
    %5 = arith.divf %3, %4 : vector<16x1xf32>
    %c0_2 = arith.constant 0 : index
    %c0_3 = arith.constant 0 : index
    %6 = memref.load %arg4[%c0_2, %c0_3] : memref<1x1xf32, #tpu.memory_space<smem>>
    %7 = vector.broadcast %6 : f32 to vector<16x32xf32>
    %8 = arith.subf %0, %7 : vector<16x32xf32>
    %cst_4 = arith.constant 9.99999997E-7 : f32
    %9 = vector.broadcast %cst_4 : f32 to vector<16x1xf32>
    %10 = arith.addf %5, %9 : vector<16x1xf32>
    %11 = math.rsqrt %10 : vector<16x1xf32>
    %12 = vector.broadcast %11 : vector<16x1xf32> to vector<16x32xf32>
    %13 = arith.mulf %8, %12 : vector<16x32xf32>
    %c0_5 = arith.constant 0 : index
    %c0_6 = arith.constant 0 : index
    %14 = vector.load %arg2[%c0_5, %c0_6] : memref<1x32xf32, #tpu.memory_space<vmem>>, vector<1x32xf32>
    %c0_7 = arith.constant 0 : index
    %c0_8 = arith.constant 0 : index
    %15 = vector.load %arg3[%c0_7, %c0_8] : memref<1x32xf32, #tpu.memory_space<vmem>>, vector<1x32xf32>
    %16 = vector.broadcast %14 : vector<1x32xf32> to vector<16x32xf32>
    %17 = arith.mulf %16, %13 : vector<16x32xf32>
    %18 = vector.broadcast %15 : vector<1x32xf32> to vector<16x32xf32>
    %19 = arith.subf %17, %18 : vector<16x32xf32>
    %c0_9 = arith.constant 0 : index
    %c0_10 = arith.constant 0 : index
    %20 = vector.load %arg5[%c0_9, %c0_10] : memref<16x32xf32, #tpu.memory_space<vmem>>, vector<16x32xf32>
    tpu.vector_store %arg5[%c0_9, %c0_10], %19 {strides = array<i32>} : memref<16x32xf32, #tpu.memory_space<vmem>>, vector<16x32xf32>,
    return
  }
  func.func @transform_0(%arg0: i32) -> (i32, i32) {
    %c0_i32 = arith.constant 0 : i32
    %c0_i32_0 = arith.constant 0 : i32
    return %arg0, %c0_i32 : i32, i32
  }
  func.func @transform_1(%arg0: i32) -> (i32, i32) {
    %c0_i32 = arith.constant 0 : i32
    %c0_i32_0 = arith.constant 0 : i32
    %c0_i32_1 = arith.constant 0 : i32
    return %c0_i32, %c0_i32_0 : i32, i32
  }
  func.func @transform_2(%arg0: i32) -> (i32, i32) {
    %c0_i32 = arith.constant 0 : i32
    %c0_i32_0 = arith.constant 0 : i32
    %c0_i32_1 = arith.constant 0 : i32
    return %c0_i32, %c0_i32_0 : i32, i32
  }
  func.func @transform_3(%arg0: i32) -> (i32, i32) {
    %c0_i32 = arith.constant 0 : i32
    %c0_i32_0 = arith.constant 0 : i32
    %c0_i32_1 = arith.constant 0 : i32
    return %c0_i32, %c0_i32_0 : i32, i32
  }
  func.func @transform_4(%arg0: i32) -> (i32, i32) {
    %c0_i32 = arith.constant 0 : i32
    %c0_i32_0 = arith.constant 0 : i32
    return %arg0, %c0_i32 : i32, i32
  }
}

</mosaic_0001>

<bundles_post_ra>
// kernel: tpu_custom_call.1
= control target key start
LH: loop header
LB: loop body
LE: loop exit
PB: predicated region body
PF: predicated region fallthrough
CT: control target
= control target key end

     0   :  { %10 = vsyncpa [#allocation4], 0  ;;  %s236_s0 = inlined_call_operand.hbm [shape: f32[16,32], index: 0, kind: input, shape index: {}]   ;;  %s237_s1 = inlined_call_operand.vmem [shape: f32[1,32], index: 1, kind: input, shape index: {}]   ;;  %s238_s2 = inlined_call_operand.vmem [shape: f32[1,32], index: 2, kind: input, shape index: {}]   ;;  %s239_s3 = inlined_call_operand.<no memory space> [shape: f32[1,1], index: 3, kind: input, shape index: {}]   ;;  %s240_s4 = inlined_call_operand.hbm [shape: f32[16,32], index: 4, kind: output, shape index: {}]  }
   0x1   :  { %11 = vsyncpa [#allocation5], 0  ;;  %s16_s17 = sshll.u32 %s236_s0, 4  ;;  %s181_s18 = smov [#allocation3]   ;;  %s17_s17 = int_to_ptr.hbm [resolvable:$true] %s16_s17 }
   0x2   :  { %s18_s19 = sshll.u32 %s181_s18, 4  ;;  %s182_s20 = smov 128   ;;  %s19_s19 = int_to_ptr.vmem [resolvable:$true] %s18_s19 }
   0x3   :  { %s183_s21 = smov 8  }
   0x4   :  { %24 = dma.hbm_to_vmem [thread:$0]  %s17_s17, 256, %s19_s19, [#allocation4], %s182_s20, %s182_s20, %s183_s21  }
   0x5   :  { %177 = dma.done.wait [#allocation4], 256  }
   0x6   :  { %178 = vsyncadd [#allocation4], 4294967040  ;;  %v35_v0 = vld [vmem:[#allocation3] sm:$0xff]  ;;  %vm39_vm0 = vcmask 261120   ;;  %v36_v2 = vld [vmem:[#allocation3 + $0x8] sm:$0xff]  ;;  %v184_v6 = vmov 32.0   ;;  %v56_v22 = vstv %s239_s3 }
   0x7   :  { %v37_v1 = vmul.f32 %v35_v0, %v35_v0  ;;  %v38_v4 = vmul.f32 %v36_v2, %v36_v2  ;;  %123 = vrcp.f32 %v184_v6  ;;  %v57_v26 = vsub.f32 %v35_v0, %v56_v22  ;;  %v121_v29 = vld [vmem:[%s237_s1] ss:$0 sm:$0xff]  ;;  %s185_s1 = smov [#allocation6]   ;;  %s103_s29 = sshll.u32 %s240_s4, 4  ;;  %s104_s29 = int_to_ptr.hbm [resolvable:$true] %s103_s29 }
   0x8   :  { %v122_v33 = vld [vmem:[%s238_s2] ss:$0 sm:$0xff]  ;;  %v58_v37 = vsub.f32 %v36_v2, %v56_v22  ;;  %s101_s3 = sshll.u32 %s185_s1, 4  ;;  %s102_s3 = int_to_ptr.vmem [resolvable:$true] %s101_s3 }
   0x9   :  { %v40_v3 = vsel %vm39_vm0, %v37_v1, 0.0  ;;  %v43_v5 = vsel %vm39_vm0, %v38_v4, 0.0 }
   0xa   :  { %41 = vadd.xlane.f32.xlu0 %v40_v3 }
   0xd   :  { %v124_v7 = vpop.eup %123 }
   0xe   :  { %v47_v8 = vmul.f32 32.0, %v124_v7  ;;  %vm51_vm1 = vweird.f32 %v124_v7 }
  0x10   :  { %v48_v9 = vsub.f32 1.0, %v47_v8 }
  0x12   :  { %44 = vadd.xlane.f32.xlu0 %v43_v5  ;;  %v49_v10 = vmul.f32 %v124_v7, %v48_v9 }
  0x14   :  { %v50_v11 = vadd.f32 %v124_v7, %v49_v10 }
  0x16   :  { %v52_v12 = vsel %vm51_vm1, %v124_v7, %v50_v11 }
  0x7d   :  { %v42_v13 = vpop.xlane.xlu0 %41 }
  0x7e   :  { %v53_v14 = vmul.f32 %v52_v12, %v42_v13 }
  0x80   :  { %v59_v15 = vadd.f32 1e-06, %v53_v14 }
  0x82   :  { %125 = vrsqrt.f32 %v59_v15  ;;  %vm67_vm3 = vweird.f32 %v59_v15 }
  0x85   :  { %v45_v16 = vpop.xlane.xlu0 %44 }
  0x86   :  { %v54_v17 = vmul.f32 %v52_v12, %v45_v16 }
  0x88   :  { %v126_v18 = vpop.eup %125  ;;  %v60_v19 = vadd.f32 1e-06, %v54_v17 }
  0x89   :  { %v62_v20 = vmul.f32 %v126_v18, %v59_v15  ;;  %vm68_vm2 = vweird.f32 %v126_v18 }
  0x8a   :  { %127 = vrsqrt.f32 %v60_v19  ;;  %vm69_vm4 = vmor %vm67_vm3, %vm68_vm2  ;;  %vm77_vm6 = vweird.f32 %v60_v19 }
  0x8b   :  { %v63_v21 = vmul.f32 %v126_v18, %v62_v20 }
  0x8d   :  { %v64_v23 = vmul.f32 0.5, %v63_v21 }
  0x8f   :  { %v65_v24 = vsub.f32 1.5, %v64_v23 }
  0x90   :  { %v128_v25 = vpop.eup %127 }
  0x91   :  { %v66_v27 = vmul.f32 %v126_v18, %v65_v24  ;;  %v72_v28 = vmul.f32 %v128_v25, %v60_v19  ;;  %vm78_vm5 = vweird.f32 %v128_v25 }
  0x92   :  { %vm79_vm7 = vmor %vm77_vm6, %vm78_vm5 }
  0x93   :  { %v70_v30 = vsel %vm69_vm4, %v126_v18, %v66_v27  ;;  %v73_v31 = vmul.f32 %v128_v25, %v72_v28 }
  0x94   :  { %v81_v32 = vmul.f32 %v70_v30, %v57_v26 }
  0x95   :  { %v74_v34 = vmul.f32 0.5, %v73_v31 }
  0x96   :  { %v88_v35 = vmul.f32 %v121_v29, %v81_v32 }
  0x97   :  { %v75_v36 = vsub.f32 1.5, %v74_v34 }
  0x98   :  { %v93_v38 = vsub.f32 %v88_v35, %v122_v33 }
  0x99   :  { %v76_v39 = vmul.f32 %v128_v25, %v75_v36 }
  0x9a   :  { %95 = vst.msk [vmem:[#allocation6] sm:$0xff] %vm39_vm0, %v93_v38 }
  0x9b   :  { %v80_v40 = vsel %vm79_vm7, %v128_v25, %v76_v39 }
  0x9c   :  { %v82_v41 = vmul.f32 %v80_v40, %v58_v37 }
  0x9e   :  { %v89_v42 = vmul.f32 %v121_v29, %v82_v41 }
  0xa0   :  { %v94_v43 = vsub.f32 %v89_v42, %v122_v33 }
  0xa2   :  { %96 = vst.msk [vmem:[#allocation6 + $0x8] sm:$0xff] %vm39_vm0, %v94_v43 }
  0xa3   :  { %109 = dma.vmem_to_hbm [thread:$0]  %s102_s3, 256, %s104_s29, [#allocation5], %s182_s20, %s182_s20, %s183_s21  }
  0xa4   :  { %179 = dma.done.wait [#allocation5], 256  }
  0xa5   :  { %180 = vsyncadd [#allocation5], 4294967040 }
  0xa6   :  { %114 = vsyncpa [#allocation4], 1 }
  0xa7   :  { %115 = vsyncpa [#allocation5], 1 }

</bundles_post_ra>
